<compile_context>
chip_gen: v6e
topology: v6e:2x2x1
jax: 0.10.0
libtpu: 0.0.40
codegen_flags: <defaults>
</compile_context>

<pallas_src>
import functools
import math

import jax
import jax.numpy as jnp
from jax.experimental import pallas as pl
from jax.experimental.pallas import tpu as pltpu

EPS = 1e-5  # GroupNorm eps (PyTorch default)


# --------------------------------------------------------------------------
# Fused kernel: GroupNorm-apply -> QKV proj -> cross-batch MHA -> out proj
# --------------------------------------------------------------------------
def _gn_mha_kernel(gsc_ref, gsh_ref, y_ref, wq_ref, wk_ref, wv_ref, wo_ref,
                   bq_ref, bk_ref, bv_ref, bo_ref, mh_ref, o_ref):
    # gsc/gsh : (B, 1, PC) f32   per-sample GroupNorm scale / shift (lane-dense)
    # y_ref   : (B, T,  PC) f32  tile of the packed raw (B, HW/P, P*C) reshape of x
    # wq/wk/wv/wo : (PC, PC) bf16 block-diagonal projection weights (y @ W^T layout,
    #               1/sqrt(head_dim) already folded into wq)
    # bq/bk/bv/bo : (1, PC) f32  P-tiled projection biases (scaling folded into bq)
    # mh_ref  : (PC, PC) bf16    block-of-ones "sum within (token, head), broadcast"
    # o_ref   : (B, T, PC) f32
    B, T, PC = y_ref.shape

    # GroupNorm(1, C, affine=False), folded into per-sample scale/shift.
    yn = y_ref[...] * gsc_ref[...] + gsh_ref[...]                    # (B, T, PC) f32
    Y = yn.reshape(B * T, PC).astype(jnp.bfloat16)                   # free leading-dim merge

    # Packed in-projection: one 128-wide MXU push per weight over the whole tile.
    Q = jnp.dot(Y, wq_ref[...], preferred_element_type=jnp.float32) + bq_ref[...]
    K = jnp.dot(Y, wk_ref[...], preferred_element_type=jnp.float32) + bk_ref[...]
    V = jnp.dot(Y, wv_ref[...], preferred_element_type=jnp.float32) + bv_ref[...]
    Qb = Q.reshape(B, T, PC)
    Kb = K.reshape(B, T, PC)
    Vb = V.reshape(B, T, PC)

    # batch_first=False MHA: sequence axis = batch samples (length B), attention
    # is independent per spatial position & head.  All (query l, key lp) pairs at
    # once; the block-ones matrix produces the head score already broadcast to
    # that head's channels, so everything downstream stays (…, PC)-lane-dense.
    # TODO(synk): for large B, stream over keys with an online-softmax carry
    # instead of materializing the (B, B, T, PC) score tensor.
    qk = (Qb[:, None, :, :] * Kb[None, :, :, :]).astype(jnp.bfloat16)   # (B,B,T,PC)
    s = jnp.dot(qk.reshape(B * B * T, PC), mh_ref[...],
                preferred_element_type=jnp.float32).reshape(B, B, T, PC)

    # Softmax over the key axis (axis=1); normalize once after the value sum.
    smax = jnp.max(s, axis=1, keepdims=True)
    e = jnp.exp(s - smax)                                            # (B,B,T,PC)
    num = jnp.sum(e * Vb[None, :, :, :], axis=1)                     # (B,T,PC)
    den = jnp.sum(e, axis=1)                                         # (B,T,PC)
    att = num * pl.reciprocal(den, approx=True)                      # EUP slot

    # Packed output projection; lane-dense (PC-wide) unmasked store.
    A = att.reshape(B * T, PC).astype(jnp.bfloat16)
    O = jnp.dot(A, wo_ref[...], preferred_element_type=jnp.float32) + bo_ref[...]
    o_ref[...] = O.reshape(B, T, PC)


# --------------------------------------------------------------------------
# Wrapper helpers
# --------------------------------------------------------------------------
def _full_spec(shape):
    nd = len(shape)
    return pl.BlockSpec(shape, lambda i, _nd=nd: (0,) * _nd)


def _block_diag(w, p):
    # P copies of w on the diagonal -> (p*C, p*C)
    return jnp.kron(jnp.eye(p, dtype=w.dtype), w)


def _choose_packed_tile(rows):
    """Packed spatial rows per grid step.

    Target large tiles (>=128 packed rows == 512 tokens at P=4) but keep >= 4
    grid steps when possible so both v7x TensorCores get >= 2 pipelined steps.
    """
    if rows <= 8:
        return rows
    cands = [c for c in range(8, min(rows, 512) + 1, 8) if rows % c == 0]
    if not cands:
        return rows
    pref = [c for c in cands if c <= 128 and rows // c >= 4]
    if pref:
        return max(pref)
    small = [c for c in cands if c <= 128]
    return max(small) if small else min(cands)


# --------------------------------------------------------------------------
# Forward wrapper
# --------------------------------------------------------------------------
def image_self_attention_forward(x_nchw, params, num_heads, tile_rows=None):
    """x_nchw: (B, C, H, W) f32 -> (B, C, H, W) f32."""
    B, C, H, W = x_nchw.shape
    HW = H * W
    assert C % num_heads == 0
    hd = C // num_heads
    scaling = 1.0 / math.sqrt(hd)

    # Lane packing: P consecutive tokens per 128-lane row (free raw reshape).
    P = 128 // C if (128 % C == 0 and HW % max(1, 128 // C) == 0) else 1
    PC = P * C
    rows = HW // P

    if tile_rows is None:
        tile_rows = _choose_packed_tile(rows)
    assert rows % tile_rows == 0 and (tile_rows % 8 == 0 or tile_rows == rows)

    # GroupNorm(1, C, affine=False) statistics in ONE fused pass over x
    # (sum + sum-of-squares), folded into per-sample scale/shift.
    xf = x_nchw.reshape(B, C * H * W).astype(jnp.float32)
    n = float(C * H * W)
    s1 = jnp.sum(xf, axis=1)
    s2 = jnp.sum(xf * xf, axis=1)
    mean = s1 / n
    var = jnp.maximum(s2 / n - mean * mean, 0.0)
    inv = jax.lax.rsqrt(var + EPS)
    gn_scale = jnp.broadcast_to(inv.reshape(B, 1, 1), (B, 1, PC)).astype(jnp.float32)
    gn_shift = jnp.broadcast_to((-mean * inv).reshape(B, 1, 1), (B, 1, PC)).astype(jnp.float32)

    # Raw (free) reshape of the NCHW buffer, packed: (B, HW, C) -> (B, rows, PC).
    y_in = x_nchw.reshape(B, rows, PC)

    # Projection weights in y @ W^T layout; 1/sqrt(hd) folded into Wq/bq;
    # block-diagonal replication keeps packed tokens independent; bf16 for MXU.
    in_w = params["in_proj_weight"]                   # (3C, C)
    in_b = params["in_proj_bias"]                     # (3C,)
    wq_t = _block_diag(in_w[:C].T * scaling, P).astype(jnp.bfloat16)
    wk_t = _block_diag(in_w[C:2 * C].T, P).astype(jnp.bfloat16)
    wv_t = _block_diag(in_w[2 * C:].T, P).astype(jnp.bfloat16)
    wo_t = _block_diag(params["out_proj_weight"].T, P).astype(jnp.bfloat16)
    bq = jnp.tile((in_b[:C] * scaling).reshape(1, C), (1, P)).astype(jnp.float32)
    bk = jnp.tile(in_b[C:2 * C].reshape(1, C), (1, P)).astype(jnp.float32)
    bv = jnp.tile(in_b[2 * C:].reshape(1, C), (1, P)).astype(jnp.float32)
    bo = jnp.tile(params["out_proj_bias"].reshape(1, C), (1, P)).astype(jnp.float32)

    # Block-of-ones "sum within (token, head) and broadcast back" matrix.
    mh = jnp.kron(jnp.eye(P * num_heads, dtype=jnp.float32),
                  jnp.ones((hd, hd), jnp.float32)).astype(jnp.bfloat16)

    # Rough VMEM budget (double-buffered in/out tiles + kernel intermediates +
    # resident weights).  Only pass an explicit limit when tiles get big, so the
    # same wrapper fits v5e (16 MiB default scoped) / v6e / v7x (64 MiB physical).
    tile_io = B * tile_rows * PC * 4
    scratch = (8 + 3 * B) * tile_io
    weights = 5 * PC * PC * 2 + 4 * PC * 4
    est = 2 * 2 * tile_io + scratch + weights
    vmem_limit = int(min(100 * 2 ** 20, 2 * est)) if est > 12 * 2 ** 20 else None

    out = pl.pallas_call(
        _gn_mha_kernel,
        out_shape=jax.ShapeDtypeStruct((B, rows, PC), jnp.float32),
        grid=(rows // tile_rows,),
        in_specs=[
            _full_spec((B, 1, PC)),                             # gn scale
            _full_spec((B, 1, PC)),                             # gn shift
            pl.BlockSpec((B, tile_rows, PC), lambda i: (0, i, 0)),
            _full_spec((PC, PC)),                               # wq_t (block-diag)
            _full_spec((PC, PC)),                               # wk_t
            _full_spec((PC, PC)),                               # wv_t
            _full_spec((PC, PC)),                               # wo_t
            _full_spec((1, PC)),                                # bq
            _full_spec((1, PC)),                                # bk
            _full_spec((1, PC)),                                # bv
            _full_spec((1, PC)),                                # bo
            _full_spec((PC, PC)),                               # block-ones head matrix
        ],
        out_specs=pl.BlockSpec((B, tile_rows, PC), lambda i: (0, i, 0)),
        compiler_params=pltpu.CompilerParams(
            dimension_semantics=("parallel",),
            vmem_limit_bytes=vmem_limit),
    )(gn_scale, gn_shift, y_in, wq_t, wk_t, wv_t, wo_t, bq, bk, bv, bo, mh)

    # Raw reshape back, exactly like the PyTorch code.
    return out.reshape(B, C, H, W)


# --------------------------------------------------------------------------
# Pure-JAX reference (literal PyTorch forward semantics, f32)
# --------------------------------------------------------------------------
def image_self_attention_reference(x, params, num_heads):
    B, C, H, W = x.shape
    mean = jnp.mean(x, axis=(1, 2, 3), keepdims=True)
    var = jnp.var(x, axis=(1, 2, 3), keepdims=True)
    xn = (x - mean) * jax.lax.rsqrt(var + EPS)
    y = xn.reshape(B, H * W, C)          # (L, N, E) under batch_first=False
    L, N, E = y.shape
    hd = E // num_heads
    qkv = y @ params["in_proj_weight"].T + params["in_proj_bias"]
    q, k, v = jnp.split(qkv, 3, axis=-1)

    def heads(t):                         # (L, N, E) -> (N, Hh, L, hd)
        return t.reshape(L, N, num_heads, hd).transpose(1, 2, 0, 3)

    qh, kh, vh = heads(q), heads(k), heads(v)
    s = jnp.einsum("nhld,nhmd->nhlm", qh, kh) / math.sqrt(hd)
    p = jax.nn.softmax(s, axis=-1)
    oh = jnp.einsum("nhlm,nhmd->nhld", p, vh)
    o = oh.transpose(2, 0, 1, 3).reshape(L, N, E)
    o = o @ params["out_proj_weight"].T + params["out_proj_bias"]
    return o.reshape(B, C, H, W)


# --------------------------------------------------------------------------
# Main
# --------------------------------------------------------------------------
if __name__ == "__main__":
    # Small, module-consistent shapes: dim=32, num_heads=4, batch=2, 16x16 spatial.
    B, C, H, W = 2, 32, 16, 16
    num_heads = 4

    key = jax.random.PRNGKey(0)
    kx, k1, k2, k3, k4 = jax.random.split(key, 5)
    x = jax.random.normal(kx, (B, C, H, W), jnp.float32)

    # Deterministic synthetic parameters (shapes follow nn.MultiheadAttention).
    in_w = jax.random.normal(k1, (3 * C, C), jnp.float32) / math.sqrt(C)
    in_b = 0.02 * jax.random.normal(k2, (3 * C,), jnp.float32)
    out_w = jax.random.normal(k3, (C, C), jnp.float32) / math.sqrt(C)
    out_b = 0.02 * jax.random.normal(k4, (C,), jnp.float32)
    params = dict(in_proj_weight=in_w, in_proj_bias=in_b,
                  out_proj_weight=out_w, out_proj_bias=out_b)

    # TODO(synk): train-mode attention-weight dropout is not implemented
    # (eval-mode forward; Dropout is identity at inference).
    fwd = jax.jit(functools.partial(image_self_attention_forward,
                                    num_heads=num_heads))
    out = jax.block_until_ready(fwd(x, params))
    assert out.shape == (B, C, H, W)

    ref = image_self_attention_reference(x, params, num_heads)
    max_err = float(jnp.max(jnp.abs(out - ref)))
    assert max_err < 5e-2, f"mismatch vs reference: max abs err = {max_err}"

    print("KERNEL_OK")
</pallas_src>

<mosaic_0001>
module attributes {stable_mosaic.version = 11 : i64} {
  func.func @_gn_mha_kernel(%arg0: i32, %arg1: memref<2x1x128xf32, #tpu.memory_space<vmem>>, %arg2: memref<2x1x128xf32, #tpu.memory_space<vmem>>, %arg3: memref<2x16x128xf32, #tpu.memory_space<vmem>>, %arg4: memref<128x128xbf16, #tpu.memory_space<vmem>>, %arg5: memref<128x128xbf16, #tpu.memory_space<vmem>>, %arg6: memref<128x128xbf16, #tpu.memory_space<vmem>>, %arg7: memref<128x128xbf16, #tpu.memory_space<vmem>>, %arg8: memref<1x128xf32, #tpu.memory_space<vmem>>, %arg9: memref<1x128xf32, #tpu.memory_space<vmem>>, %arg10: memref<1x128xf32, #tpu.memory_space<vmem>>, %arg11: memref<1x128xf32, #tpu.memory_space<vmem>>, %arg12: memref<128x128xbf16, #tpu.memory_space<vmem>>, %arg13: memref<2x16x128xf32, #tpu.memory_space<vmem>>) attributes {dimension_semantics = [#tpu.dimension_semantics<parallel>], iteration_bounds = array<i64: 4>, scalar_prefetch = 0 : i64, scratch_operands = 0 : i64, tpu.core_type = #tpu.core_type<tc>, window_params = [{pipeline_mode = #tpu.pipeline_mode<synchronous>, transform_indices = @transform_0, window_bounds = array<i64: 2, 1, 128>}, {pipeline_mode = #tpu.pipeline_mode<synchronous>, transform_indices = @transform_1, window_bounds = array<i64: 2, 1, 128>}, {transform_indices = @transform_2, window_bounds = array<i64: 2, 16, 128>}, {pipeline_mode = #tpu.pipeline_mode<synchronous>, transform_indices = @transform_3, window_bounds = array<i64: 128, 128>}, {pipeline_mode = #tpu.pipeline_mode<synchronous>, transform_indices = @transform_4, window_bounds = array<i64: 128, 128>}, {pipeline_mode = #tpu.pipeline_mode<synchronous>, transform_indices = @transform_5, window_bounds = array<i64: 128, 128>}, {pipeline_mode = #tpu.pipeline_mode<synchronous>, transform_indices = @transform_6, window_bounds = array<i64: 128, 128>}, {pipeline_mode = #tpu.pipeline_mode<synchronous>, transform_indices = @transform_7, window_bounds = array<i64: 1, 128>}, {pipeline_mode = #tpu.pipeline_mode<synchronous>, transform_indices = @transform_8, window_bounds = array<i64: 1, 128>}, {pipeline_mode = #tpu.pipeline_mode<synchronous>, transform_indices = @transform_9, window_bounds = array<i64: 1, 128>}, {pipeline_mode = #tpu.pipeline_mode<synchronous>, transform_indices = @transform_10, window_bounds = array<i64: 1, 128>}, {pipeline_mode = #tpu.pipeline_mode<synchronous>, transform_indices = @transform_11, window_bounds = array<i64: 128, 128>}, {transform_indices = @transform_12, window_bounds = array<i64: 2, 16, 128>}]} {
    %c0 = arith.constant 0 : index
    %c0_0 = arith.constant 0 : index
    %c0_1 = arith.constant 0 : index
    %0 = vector.load %arg3[%c0, %c0_0, %c0_1] : memref<2x16x128xf32, #tpu.memory_space<vmem>>, vector<2x16x128xf32>
    %c0_2 = arith.constant 0 : index
    %c0_3 = arith.constant 0 : index
    %c0_4 = arith.constant 0 : index
    %1 = vector.load %arg1[%c0_2, %c0_3, %c0_4] : memref<2x1x128xf32, #tpu.memory_space<vmem>>, vector<2x1x128xf32>
    %2 = vector.broadcast %1 : vector<2x1x128xf32> to vector<2x16x128xf32>
    %3 = arith.mulf %0, %2 : vector<2x16x128xf32>
    %c0_5 = arith.constant 0 : index
    %c0_6 = arith.constant 0 : index
    %c0_7 = arith.constant 0 : index
    %4 = vector.load %arg2[%c0_5, %c0_6, %c0_7] : memref<2x1x128xf32, #tpu.memory_space<vmem>>, vector<2x1x128xf32>
    %5 = vector.broadcast %4 : vector<2x1x128xf32> to vector<2x16x128xf32>
    %6 = arith.addf %3, %5 : vector<2x16x128xf32>
    %7 = vector.shape_cast %6 : vector<2x16x128xf32> to vector<32x128xf32>
    %8 = arith.truncf %7 : vector<32x128xf32> to vector<32x128xbf16>
    %c0_8 = arith.constant 0 : index
    %c0_9 = arith.constant 0 : index
    %9 = vector.load %arg4[%c0_8, %c0_9] : memref<128x128xbf16, #tpu.memory_space<vmem>>, vector<128x128xbf16>
    %cst = arith.constant dense<0.000000e+00> : vector<32x128xf32>
    %10 = tpu.matmul %8, %9, %cst {dimension_numbers = #tpu.dot_dimension_numbers<[1], [0], [0], [1], [0, 0, 1, 1], [], []>} : vector<32x128xbf16>, vector<128x128xbf16>, vector<32x128xf32> -> vector<32x128xf32>
    %c0_10 = arith.constant 0 : index
    %c0_11 = arith.constant 0 : index
    %11 = vector.load %arg8[%c0_10, %c0_11] : memref<1x128xf32, #tpu.memory_space<vmem>>, vector<1x128xf32>
    %12 = vector.broadcast %11 : vector<1x128xf32> to vector<32x128xf32>
    %13 = arith.addf %10, %12 : vector<32x128xf32>
    %c0_12 = arith.constant 0 : index
    %c0_13 = arith.constant 0 : index
    %14 = vector.load %arg5[%c0_12, %c0_13] : memref<128x128xbf16, #tpu.memory_space<vmem>>, vector<128x128xbf16>
    %cst_14 = arith.constant dense<0.000000e+00> : vector<32x128xf32>
    %15 = tpu.matmul %8, %14, %cst_14 {dimension_numbers = #tpu.dot_dimension_numbers<[1], [0], [0], [1], [0, 0, 1, 1], [], []>} : vector<32x128xbf16>, vector<128x128xbf16>, vector<32x128xf32> -> vector<32x128xf32>
    %c0_15 = arith.constant 0 : index
    %c0_16 = arith.constant 0 : index
    %16 = vector.load %arg9[%c0_15, %c0_16] : memref<1x128xf32, #tpu.memory_space<vmem>>, vector<1x128xf32>
    %17 = vector.broadcast %16 : vector<1x128xf32> to vector<32x128xf32>
    %18 = arith.addf %15, %17 : vector<32x128xf32>
    %c0_17 = arith.constant 0 : index
    %c0_18 = arith.constant 0 : index
    %19 = vector.load %arg6[%c0_17, %c0_18] : memref<128x128xbf16, #tpu.memory_space<vmem>>, vector<128x128xbf16>
    %cst_19 = arith.constant dense<0.000000e+00> : vector<32x128xf32>
    %20 = tpu.matmul %8, %19, %cst_19 {dimension_numbers = #tpu.dot_dimension_numbers<[1], [0], [0], [1], [0, 0, 1, 1], [], []>} : vector<32x128xbf16>, vector<128x128xbf16>, vector<32x128xf32> -> vector<32x128xf32>
    %c0_20 = arith.constant 0 : index
    %c0_21 = arith.constant 0 : index
    %21 = vector.load %arg10[%c0_20, %c0_21] : memref<1x128xf32, #tpu.memory_space<vmem>>, vector<1x128xf32>
    %22 = vector.broadcast %21 : vector<1x128xf32> to vector<32x128xf32>
    %23 = arith.addf %20, %22 : vector<32x128xf32>
    %24 = vector.shape_cast %13 : vector<32x128xf32> to vector<2x16x128xf32>
    %25 = vector.shape_cast %18 : vector<32x128xf32> to vector<2x16x128xf32>
    %26 = vector.shape_cast %23 : vector<32x128xf32> to vector<2x16x128xf32>
    %27 = vector.shape_cast %24 : vector<2x16x128xf32> to vector<2x1x16x128xf32>
    %28 = vector.shape_cast %25 : vector<2x16x128xf32> to vector<1x2x16x128xf32>
    %29 = vector.broadcast %27 : vector<2x1x16x128xf32> to vector<2x2x16x128xf32>
    %30 = vector.broadcast %28 : vector<1x2x16x128xf32> to vector<2x2x16x128xf32>
    %31 = arith.mulf %29, %30 : vector<2x2x16x128xf32>
    %32 = arith.truncf %31 : vector<2x2x16x128xf32> to vector<2x2x16x128xbf16>
    %33 = vector.shape_cast %32 : vector<2x2x16x128xbf16> to vector<64x128xbf16>
    %c0_22 = arith.constant 0 : index
    %c0_23 = arith.constant 0 : index
    %34 = vector.load %arg12[%c0_22, %c0_23] : memref<128x128xbf16, #tpu.memory_space<vmem>>, vector<128x128xbf16>
    %cst_24 = arith.constant dense<0.000000e+00> : vector<64x128xf32>
    %35 = tpu.matmul %33, %34, %cst_24 {dimension_numbers = #tpu.dot_dimension_numbers<[1], [0], [0], [1], [0, 0, 1, 1], [], []>} : vector<64x128xbf16>, vector<128x128xbf16>, vector<64x128xf32> -> vector<64x128xf32>
    %36 = vector.shape_cast %35 : vector<64x128xf32> to vector<2x2x16x128xf32>
    %cst_25 = arith.constant dense<0xFF800000> : vector<2x16x128xf32>
    %37 = vector.multi_reduction <maximumf>, %36, %cst_25 [1] : vector<2x2x16x128xf32> to vector<2x16x128xf32>
    %38 = vector.shape_cast %37 : vector<2x16x128xf32> to vector<2x1x16x128xf32>
    %39 = vector.broadcast %38 : vector<2x1x16x128xf32> to vector<2x2x16x128xf32>
    %40 = arith.subf %36, %39 : vector<2x2x16x128xf32>
    %41 = math.exp %40 : vector<2x2x16x128xf32>
    %42 = vector.shape_cast %26 : vector<2x16x128xf32> to vector<1x2x16x128xf32>
    %43 = vector.broadcast %42 : vector<1x2x16x128xf32> to vector<2x2x16x128xf32>
    %44 = arith.mulf %41, %43 : vector<2x2x16x128xf32>
    %cst_26 = arith.constant dense<0.000000e+00> : vector<2x16x128xf32>
    %45 = vector.multi_reduction <add>, %44, %cst_26 [1] : vector<2x2x16x128xf32> to vector<2x16x128xf32>
    %cst_27 = arith.constant dense<0.000000e+00> : vector<2x16x128xf32>
    %46 = vector.multi_reduction <add>, %41, %cst_27 [1] : vector<2x2x16x128xf32> to vector<2x16x128xf32>
    %47 = tpu.reciprocal %46 {approx = true} : vector<2x16x128xf32> -> vector<2x16x128xf32>
    %48 = arith.mulf %45, %47 : vector<2x16x128xf32>
    %49 = vector.shape_cast %48 : vector<2x16x128xf32> to vector<32x128xf32>
    %50 = arith.truncf %49 : vector<32x128xf32> to vector<32x128xbf16>
    %c0_28 = arith.constant 0 : index
    %c0_29 = arith.constant 0 : index
    %51 = vector.load %arg7[%c0_28, %c0_29] : memref<128x128xbf16, #tpu.memory_space<vmem>>, vector<128x128xbf16>
    %cst_30 = arith.constant dense<0.000000e+00> : vector<32x128xf32>
    %52 = tpu.matmul %50, %51, %cst_30 {dimension_numbers = #tpu.dot_dimension_numbers<[1], [0], [0], [1], [0, 0, 1, 1], [], []>} : vector<32x128xbf16>, vector<128x128xbf16>, vector<32x128xf32> -> vector<32x128xf32>
    %c0_31 = arith.constant 0 : index
    %c0_32 = arith.constant 0 : index
    %53 = vector.load %arg11[%c0_31, %c0_32] : memref<1x128xf32, #tpu.memory_space<vmem>>, vector<1x128xf32>
    %54 = vector.broadcast %53 : vector<1x128xf32> to vector<32x128xf32>
    %55 = arith.addf %52, %54 : vector<32x128xf32>
    %56 = vector.shape_cast %55 : vector<32x128xf32> to vector<2x16x128xf32>
    %c0_33 = arith.constant 0 : index
    %c0_34 = arith.constant 0 : index
    %c0_35 = arith.constant 0 : index
    %57 = vector.load %arg13[%c0_33, %c0_34, %c0_35] : memref<2x16x128xf32, #tpu.memory_space<vmem>>, vector<2x16x128xf32>
    tpu.vector_store %arg13[%c0_33, %c0_34, %c0_35], %56 {strides = array<i32>} : memref<2x16x128xf32, #tpu.memory_space<vmem>>, vector<2x16x128xf32>,
    return
  }
  func.func @transform_0(%arg0: i32) -> (i32, i32, i32) {
    %c0_i32 = arith.constant 0 : i32
    %c0_i32_0 = arith.constant 0 : i32
    %c0_i32_1 = arith.constant 0 : i32
    %c0_i32_2 = arith.constant 0 : i32
    return %c0_i32, %c0_i32_0, %c0_i32_1 : i32, i32, i32
  }
  func.func @transform_1(%arg0: i32) -> (i32, i32, i32) {
    %c0_i32 = arith.constant 0 : i32
    %c0_i32_0 = arith.constant 0 : i32
    %c0_i32_1 = arith.constant 0 : i32
    %c0_i32_2 = arith.constant 0 : i32
    return %c0_i32, %c0_i32_0, %c0_i32_1 : i32, i32, i32
  }
  func.func @transform_2(%arg0: i32) -> (i32, i32, i32) {
    %c0_i32 = arith.constant 0 : i32
    %c0_i32_0 = arith.constant 0 : i32
    %c0_i32_1 = arith.constant 0 : i32
    return %c0_i32, %arg0, %c0_i32_0 : i32, i32, i32
  }
  func.func @transform_3(%arg0: i32) -> (i32, i32) {
    %c0_i32 = arith.constant 0 : i32
    %c0_i32_0 = arith.constant 0 : i32
    %c0_i32_1 = arith.constant 0 : i32
    return %c0_i32, %c0_i32_0 : i32, i32
  }
  func.func @transform_4(%arg0: i32) -> (i32, i32) {
    %c0_i32 = arith.constant 0 : i32
    %c0_i32_0 = arith.constant 0 : i32
    %c0_i32_1 = arith.constant 0 : i32
    return %c0_i32, %c0_i32_0 : i32, i32
  }
  func.func @transform_5(%arg0: i32) -> (i32, i32) {
    %c0_i32 = arith.constant 0 : i32
    %c0_i32_0 = arith.constant 0 : i32
    %c0_i32_1 = arith.constant 0 : i32
    return %c0_i32, %c0_i32_0 : i32, i32
  }
  func.func @transform_6(%arg0: i32) -> (i32, i32) {
    %c0_i32 = arith.constant 0 : i32
    %c0_i32_0 = arith.constant 0 : i32
    %c0_i32_1 = arith.constant 0 : i32
    return %c0_i32, %c0_i32_0 : i32, i32
  }
  func.func @transform_7(%arg0: i32) -> (i32, i32) {
    %c0_i32 = arith.constant 0 : i32
    %c0_i32_0 = arith.constant 0 : i32
    %c0_i32_1 = arith.constant 0 : i32
    return %c0_i32, %c0_i32_0 : i32, i32
  }
  func.func @transform_8(%arg0: i32) -> (i32, i32) {
    %c0_i32 = arith.constant 0 : i32
    %c0_i32_0 = arith.constant 0 : i32
    %c0_i32_1 = arith.constant 0 : i32
    return %c0_i32, %c0_i32_0 : i32, i32
  }
  func.func @transform_9(%arg0: i32) -> (i32, i32) {
    %c0_i32 = arith.constant 0 : i32
    %c0_i32_0 = arith.constant 0 : i32
    %c0_i32_1 = arith.constant 0 : i32
    return %c0_i32, %c0_i32_0 : i32, i32
  }
  func.func @transform_10(%arg0: i32) -> (i32, i32) {
    %c0_i32 = arith.constant 0 : i32
    %c0_i32_0 = arith.constant 0 : i32
    %c0_i32_1 = arith.constant 0 : i32
    return %c0_i32, %c0_i32_0 : i32, i32
  }
  func.func @transform_11(%arg0: i32) -> (i32, i32) {
    %c0_i32 = arith.constant 0 : i32
    %c0_i32_0 = arith.constant 0 : i32
    %c0_i32_1 = arith.constant 0 : i32
    return %c0_i32, %c0_i32_0 : i32, i32
  }
  func.func @transform_12(%arg0: i32) -> (i32, i32, i32) {
    %c0_i32 = arith.constant 0 : i32
    %c0_i32_0 = arith.constant 0 : i32
    %c0_i32_1 = arith.constant 0 : i32
    return %c0_i32, %arg0, %c0_i32_0 : i32, i32, i32
  }
}

</mosaic_0001>

<bundles_post_ra>
// kernel: image_self_attention_forward.1
= control target key start
LH: loop header
LB: loop body
LE: loop exit
PB: predicated region body
PF: predicated region fallthrough
CT: control target
= control target key end

     0   :  { %s1689_s21 = smov 0   ;;  %s1691_s22 = smov 0   ;;  %s1897_s0 = inlined_call_operand.vmem [shape: f32[2,1,128], index: 0, kind: input, shape index: {}]   ;;  %s1898_s1 = inlined_call_operand.vmem [shape: f32[2,1,128], index: 1, kind: input, shape index: {}]   ;;  %s1899_s2 = inlined_call_operand.vmem [shape: f32[2,64,128], index: 2, kind: input, shape index: {}]   ;;  %s1900_s3 = inlined_call_operand.vmem [shape: bf16[128,128], index: 3, kind: input, shape index: {}]   ;;  %s1901_s4 = inlined_call_operand.vmem [shape: bf16[128,128], index: 4, kind: input, shape index: {}]   ;;  %s1902_s5 = inlined_call_operand.vmem [shape: bf16[128,128], index: 5, kind: input, shape index: {}]   ;;  %s1903_s6 = inlined_call_operand.vmem [shape: bf16[128,128], index: 6, kind: input, shape index: {}]   ;;  %s1904_s7 = inlined_call_operand.vmem [shape: f32[1,128], index: 7, kind: input, shape index: {}]   ;;  %s1905_s8 = inlined_call_operand.vmem [shape: f32[1,128], index: 8, kind: input, shape index: {}]   ;;  %s1906_s9 = inlined_call_operand.vmem [shape: f32[1,128], index: 9, kind: input, shape index: {}]   ;;  %s1907_s10 = inlined_call_operand.vmem [shape: f32[1,128], index: 10, kind: input, shape index: {}]   ;;  %s1908_s11 = inlined_call_operand.vmem [shape: bf16[128,128], index: 11, kind: input, shape index: {}]   ;;  %s1909_s12 = inlined_call_operand.vmem [shape: f32[2,64,128], index: 12, kind: output, shape index: {}]  }
   0x1   :  { %s1693_s23 = smov 0  }
   0x2 LB: > { %s1291_s24 = sadd.s32 4294967295, %s1622_s23   ;;  %s1706_s25 = sadd.s32 1, %s1622_s23   ;;  %s1622_s23 = sphi %s1693_s23, %s1913_s23   ;;  %s1618_s22 = sphi %s1691_s22, %s1912_s22   ;;  %s1614_s21 = sphi %s1689_s21, %s1911_s21  }
   0x3   : > { %s68_s26 = ssub.s32 %s1622_s23, %s1706_s25  ;;  %s71_s27 = sadd.s32 1, %s1618_s22 }
   0x4   : > { %p69_p0 = scmp.eq.s32.totalorder %s68_s26, 0  ;;  %p78_p1 = scmp.ne.s32.totalorder %s1618_s22, %s1614_s21 }
   0x5   : > { %p79_p2 = scmp.eq.s32.totalorder %s1622_s23, 0  ;;  %p297_p3 = scmp.eq.s32.totalorder %s1291_s24, 3 }
   0x6   : > { %s1717_s28 = scalar_select %p69_p0, %s1618_s22, %s71_s27  }
   0x7   : > { %p80_p4 = por %p79_p2, %p78_p1  ;;  %p1719_p5 = por %p297_p3, %p78_p1 }
   0x8   : > { %p1294_p6 = scmp.ge.s32.totalorder %s1622_s23, 4 }
   0xa   : > { %352 = sbr.rel (%p1294_p6) target bundleno = 21 (0x15), region = 60 }
   0xf   : > { %355 = sbr.rel (!%p80_p4) target bundleno = 21 (0x15), region = 64  ;;  %s357_s30 = sand.u32 (%p80_p4), 1, %s1618_s22  }
  0x10   : > { %s1354_s13 = sshll.u32 (%p80_p4), %s1622_s23, 4  ;;  %s1295_s14 = sshll.u32 (%p80_p4), %s357_s30, 5 }
  0x11   : > { %s362_s17 = scalar_lea.vmem (%p80_p4), %s1899_s2, %s1354_s13  ;;  %s359_s18 = scalar_lea.vmem (%p80_p4), [#allocation2], %s1295_s14 }
  0x12   : > { %v397_v0 = vld [vmem:[%s362_s17] sm:$0xff] (%p80_p4)  ;;  %v399_v1 = vld [vmem:[%s362_s17 + $0x8] sm:$0xff] (%p80_p4) }
  0x13   : > { %v401_v2 = vld [vmem:[%s362_s17 + $0x40] sm:$0xff] (%p80_p4)  ;;  %398 = vst [vmem:[%s359_s18] sm:$0xff] (%p80_p4), %v397_v0  ;;  %400 = vst [vmem:[%s359_s18 + $0x8] sm:$0xff] (%p80_p4), %v399_v1  ;;  %v403_v3 = vld [vmem:[%s362_s17 + $0x48] sm:$0xff] (%p80_p4) }
  0x14   : > { %402 = vst [vmem:[%s359_s18 + $0x10] sm:$0xff] %v401_v2  ;;  %404 = vst [vmem:[%s359_s18 + $0x18] sm:$0xff] %v403_v3 }
  0x15 PF: > { %p1298_p7 = scmp.ge.s32.totalorder %s1622_s23, 1  ;;  %p409_p8 = scmp.lt.s32.totalorder %s1622_s23, 5 }
  0x17   : > { %p410_p9 = pnand %p1298_p7, %p409_p8 }
  0x18   : > { %s416_s20 = sand.u32 (!%p410_p9), 1, %s1614_s21  }
  0x19   : > { %413 = sbr.rel (%p410_p9) target bundleno = 728 (0x2d8), region = 102  ;;  %s1756_s14 = sshll.u32 (!%p410_p9), %s416_s20, 5 }
  0x1a   : > { %s418_s20 = scalar_lea.vmem (!%p410_p9), [#allocation2], %s1756_s14  ;;  %s455_s18 = scalar_lea.vmem (!%p410_p9), [#allocation3], %s1756_s14 }
  0x1e   : > { %v1536_v4 = vld [vmem:[%s1900_s3 + $0x38] sm:$0xff]   ;;  %v1538_v6 = vld [vmem:[%s1900_s3 + $0x30] sm:$0xff]   ;;  %v1540_v8 = vld [vmem:[%s1900_s3 + $0x28] sm:$0xff]   ;;  %s1355_s19 = sshll.u32 (%p1719_p5), %s1291_s24, 4 }
  0x1f   : > { %v1537_v5 = vld [vmem:[%s1901_s4 + $0x38] sm:$0xff]   ;;  %1408 = vmatprep.subr.bf16.mxu0 %v1536_v4  ;;  %v1539_v7 = vld [vmem:[%s1901_s4 + $0x30] sm:$0xff]   ;;  %v1541_v9 = vld [vmem:[%s1901_s4 + $0x28] sm:$0xff]   ;;  %s1189_s27 = scalar_lea.vmem (%p1719_p5), %s1909_s12, %s1355_s19 }
  0x20   : > { %1428 = vmatprep.subr.bf16.mxu1 %v1537_v5  ;;  %1409 = vmatpush3.bf16.msra.mxu0 %v1536_v4  ;;  %v1542_v10 = vld [vmem:[%s1900_s3 + $0x20] sm:$0xff]   ;;  %v1544_v12 = vld [vmem:[%s1900_s3 + $0x18] sm:$0xff]   ;;  %v1546_v14 = vld [vmem:[%s1900_s3 + $0x10] sm:$0xff]  }
  0x21   : > { %1429 = vmatpush3.bf16.msra.mxu1 %v1537_v5  ;;  %1410 = vmatprep.subr.bf16.mxu0 %v1538_v6  ;;  %v1543_v11 = vld [vmem:[%s1901_s4 + $0x20] sm:$0xff]   ;;  %v1545_v13 = vld [vmem:[%s1901_s4 + $0x18] sm:$0xff]   ;;  %v460_v16 = vld [vmem:[%s418_s20 + $0x8] sm:$0xff] }
  0x22   : > { %1430 = vmatprep.subr.bf16.mxu1 %v1539_v7  ;;  %v459_v15 = vld [vmem:[%s418_s20] sm:$0xff]  ;;  %v1547_v18 = vld [vmem:[%s1901_s4 + $0x10] sm:$0xff]   ;;  %v462_v23 = vld [vmem:[%s418_s20 + $0x18] sm:$0xff] }
  0x23   : > { %v1301_v17 = vld [vmem:[%s1897_s0] ss:$0 sm:$0xff]  ;;  %v461_v22 = vld [vmem:[%s418_s20 + $0x10] sm:$0xff]  ;;  %v1302_v26 = vld [vmem:[%s1897_s0 + $0x1] ss:$0 sm:$0xff] }
  0x24   : > { %1411 = vmatpush3.bf16.msra.mxu0 %v1538_v6  ;;  %v477_v19 = vmul.f32 %v1301_v17, %v459_v15  ;;  %v478_v20 = vmul.f32 %v1301_v17, %v460_v16  ;;  %v1303_v21 = vld [vmem:[%s1898_s1] ss:$0 sm:$0xff]  ;;  %v1548_v27 = vld [vmem:[%s1900_s3 + $0x8] sm:$0xff]   ;;  %v479_v31 = vmul.f32 %v1302_v26, %v461_v22  ;;  %v480_v32 = vmul.f32 %v1302_v26, %v462_v23  ;;  %v1304_v34 = vld [vmem:[%s1898_s1 + $0x1] ss:$0 sm:$0xff] }
  0x25   : > { %1431 = vmatpush3.bf16.msra.mxu1 %v1539_v7  ;;  %1412 = vmatprep.subr.bf16.mxu0 %v1540_v8  ;;  %v1549_v28 = vld [vmem:[%s1901_s4 + $0x8] sm:$0xff]   ;;  %v1550_v30 = vld [vmem:[%s1900_s3] sm:$0xff]   ;;  %v1552_v37 = vld [vmem:[%s1908_s11 + $0x38] sm:$0xff]  }
  0x26   : > { %1432 = vmatprep.subr.bf16.mxu1 %v1541_v9  ;;  %v495_v24 = vadd.f32 %v1303_v21, %v477_v19  ;;  %v496_v25 = vadd.f32 %v1303_v21, %v478_v20  ;;  %v1551_v33 = vld [vmem:[%s1901_s4] sm:$0xff]   ;;  %v497_v35 = vadd.f32 %v1304_v34, %v479_v31  ;;  %v498_v36 = vadd.f32 %v1304_v34, %v480_v32  ;;  %v1553_v39 = vld [vmem:[%s1908_s11 + $0x30] sm:$0xff]   ;;  %v1554_v40 = vld [vmem:[%s1908_s11 + $0x28] sm:$0xff]  }
  0x27   : > { %v1555_v41 = vld [vmem:[%s1908_s11 + $0x20] sm:$0xff]   ;;  %v1556_v42 = vld [vmem:[%s1908_s11 + $0x18] sm:$0xff]   ;;  %v1558_v44 = vld [vmem:[%s1908_s11 + $0x10] sm:$0xff]  }
  0x28   : > { %1413 = vmatpush3.bf16.msra.mxu0 %v1540_v8  ;;  %v499_v29 = vpack.c.bf16 %v496_v25, %v495_v24  ;;  %v500_v38 = vpack.c.bf16 %v498_v36, %v497_v35  ;;  %v1557_v43 = vld [vmem:[%s1902_s5 + $0x38] sm:$0xff]   ;;  %v1559_v45 = vld [vmem:[%s1902_s5 + $0x30] sm:$0xff]   ;;  %v1560_v46 = vld [vmem:[%s1908_s11 + $0x8] sm:$0xff]  }
  0x29   : > { %1433 = vmatpush3.bf16.msra.mxu1 %v1541_v9  ;;  %1414 = vmatprep.subr.bf16.mxu0 %v1542_v10  ;;  %v1561_v47 = vld [vmem:[%s1902_s5 + $0x28] sm:$0xff]   ;;  %v1562_v48 = vld [vmem:[%s1908_s11] sm:$0xff]   ;;  %v1564_v50 = vld [vmem:[%s1902_s5 + $0x18] sm:$0xff]  }
  0x2a   : > { %1434 = vmatprep.subr.bf16.mxu1 %v1543_v11  ;;  %1424 = vmatprep.mubr.bf16.mxu0 %v499_v29  ;;  %v1563_v49 = vld [vmem:[%s1902_s5 + $0x20] sm:$0xff]   ;;  %v1565_v51 = vld [vmem:[%s1902_s5 + $0x10] sm:$0xff]   ;;  %v1566_v52 = vld [vmem:[%s1902_s5 + $0x8] sm:$0xff]  }
  0x2b   : > { %1444 = vmatprep.mubr.bf16.mxu1 %v499_v29  ;;  %v1567_v53 = vld [vmem:[%s1902_s5] sm:$0xff]   ;;  %v1568_v20 = vld [vmem:[%s1903_s6 + $0x38] sm:$0xff]   ;;  %v1569_v21 = vld [vmem:[%s1903_s6 + $0x30] sm:$0xff]  }
  0x2c   : > { %1415 = vmatpush3.bf16.msra.mxu0 %v1542_v10  ;;  %v1305_v58 = vld [vmem:[%s1904_s7] ss:$0 sm:$0xff]  ;;  %v1570_v22 = vld [vmem:[%s1903_s6 + $0x28] sm:$0xff]   ;;  %v1572_v24 = vld [vmem:[%s1903_s6 + $0x18] sm:$0xff]  }
  0x2d   : > { %1435 = vmatpush3.bf16.msra.mxu1 %v1543_v11  ;;  %1416 = vmatprep.subr.bf16.mxu0 %v1544_v12  ;;  %v1314_v59 = vld [vmem:[%s1905_s8] ss:$0 sm:$0xff]  ;;  %v1573_v25 = vld [vmem:[%s1903_s6 + $0x10] sm:$0xff]   ;;  %v1574_v26 = vld [vmem:[%s1903_s6 + $0x8] sm:$0xff]  }
  0x2e   : > { %1436 = vmatprep.subr.bf16.mxu1 %v1545_v13  ;;  %v1571_v23 = vld [vmem:[%s1903_s6 + $0x20] sm:$0xff]  }
  0x30   : > { %1417 = vmatpush3.bf16.msra.mxu0 %v1544_v12 }
  0x31   : > { %1437 = vmatpush3.bf16.msra.mxu1 %v1545_v13  ;;  %1418 = vmatprep.subr.bf16.mxu0 %v1546_v14 }
  0x32   : > { %1438 = vmatprep.subr.bf16.mxu1 %v1547_v18 }
  0x34   : > { %1419 = vmatpush3.bf16.msra.mxu0 %v1546_v14 }
  0x35   : > { %1439 = vmatpush3.bf16.msra.mxu1 %v1547_v18  ;;  %1420 = vmatprep.subr.bf16.mxu0 %v1548_v27 }
  0x36   : > { %1440 = vmatprep.subr.bf16.mxu1 %v1549_v28 }
  0x38   : > { %1421 = vmatpush3.bf16.msra.mxu0 %v1548_v27  ;;  %v1575_v27 = vld [vmem:[%s1903_s6] sm:$0xff]  }
  0x39   : > { %1441 = vmatpush3.bf16.msra.mxu1 %v1549_v28  ;;  %1422 = vmatprep.subr.bf16.mxu0 %v1550_v30 }
  0x3a   : > { %1442 = vmatprep.subr.bf16.mxu1 %v1551_v33 }
  0x3c   : > { %1423 = vmatpush3.bf16.msra.mxu0 %v1550_v30 }
  0x3d   : > { %1443 = vmatpush3.bf16.msra.mxu1 %v1551_v33  ;;  %1448 = vmatprep.subr.bf16.mxu0 %v1557_v43 }
  0x3e   : > { %1468 = vmatprep.subr.bf16.mxu1 %v1552_v37 }
  0x3f   : > { %1425 = vmatmul.mubr.bf16.vlgmr.msra.gmra.mxu0 %v500_v38 }
  0x40   : > { %1445 = vmatmul.mubr.bf16.vlgmr.msra.gmra.mxu1 %v500_v38  ;;  %1464 = vmatprep.mubr.bf16.mxu0 %v499_v29 }
  0x41   : > { %1469 = vmatpush3.bf16.msra.mxu1 %v1552_v37  ;;  %1449 = vmatpush3.bf16.msra.mxu0 %v1557_v43 }
  0x42   : > { %1470 = vmatprep.subr.bf16.mxu1 %v1553_v39  ;;  %1450 = vmatprep.subr.bf16.mxu0 %v1559_v45 }
  0x45   : > { %1471 = vmatpush3.bf16.msra.mxu1 %v1553_v39  ;;  %1451 = vmatpush3.bf16.msra.mxu0 %v1559_v45 }
  0x46   : > { %1472 = vmatprep.subr.bf16.mxu1 %v1554_v40  ;;  %1452 = vmatprep.subr.bf16.mxu0 %v1561_v47 }
  0x49   : > { %1473 = vmatpush3.bf16.msra.mxu1 %v1554_v40  ;;  %1453 = vmatpush3.bf16.msra.mxu0 %v1561_v47 }
  0x4a   : > { %1474 = vmatprep.subr.bf16.mxu1 %v1555_v41  ;;  %1454 = vmatprep.subr.bf16.mxu0 %v1563_v49 }
  0x4d   : > { %1475 = vmatpush3.bf16.msra.mxu1 %v1555_v41  ;;  %1455 = vmatpush3.bf16.msra.mxu0 %v1563_v49 }
  0x4e   : > { %1476 = vmatprep.subr.bf16.mxu1 %v1556_v42  ;;  %1456 = vmatprep.subr.bf16.mxu0 %v1564_v50 }
  0x51   : > { %1477 = vmatpush3.bf16.msra.mxu1 %v1556_v42  ;;  %1457 = vmatpush3.bf16.msra.mxu0 %v1564_v50 }
  0x52   : > { %1478 = vmatprep.subr.bf16.mxu1 %v1558_v44  ;;  %1458 = vmatprep.subr.bf16.mxu0 %v1565_v51 }
  0x55   : > { %1479 = vmatpush3.bf16.msra.mxu1 %v1558_v44  ;;  %1459 = vmatpush3.bf16.msra.mxu0 %v1565_v51 }
  0x56   : > { %1480 = vmatprep.subr.bf16.mxu1 %v1560_v46  ;;  %1460 = vmatprep.subr.bf16.mxu0 %v1566_v52 }
  0x59   : > { %1481 = vmatpush3.bf16.msra.mxu1 %v1560_v46  ;;  %1461 = vmatpush3.bf16.msra.mxu0 %v1566_v52 }
  0x5a   : > { %1482 = vmatprep.subr.bf16.mxu1 %v1562_v48  ;;  %1462 = vmatprep.subr.bf16.mxu0 %v1567_v53 }
  0x5d   : > { %1483 = vmatpush3.bf16.msra.mxu1 %v1562_v48  ;;  %1463 = vmatpush3.bf16.msra.mxu0 %v1567_v53 }
  0x5e   : > { %1492 = vmatprep.subr.bf16.mxu0 %v1568_v20 }
  0x60   : > { %1465 = vmatmul.mubr.bf16.vlgmr.msra.gmra.mxu0 %v500_v38 }
  0x61   : > { %1493 = vmatpush3.bf16.msra.mxu0 %v1568_v20 }
  0x62   : > { %1494 = vmatprep.subr.bf16.mxu0 %v1569_v21 }
  0x65   : > { %1495 = vmatpush3.bf16.msra.mxu0 %v1569_v21 }
  0x66   : > { %1496 = vmatprep.subr.bf16.mxu0 %v1570_v22 }
  0x69   : > { %1497 = vmatpush3.bf16.msra.mxu0 %v1570_v22 }
  0x6a   : > { %1498 = vmatprep.subr.bf16.mxu0 %v1571_v23 }
  0x6d   : > { %1499 = vmatpush3.bf16.msra.mxu0 %v1571_v23 }
  0x6e   : > { %1500 = vmatprep.subr.bf16.mxu0 %v1572_v24 }
  0x71   : > { %1501 = vmatpush3.bf16.msra.mxu0 %v1572_v24 }
  0x72   : > { %1502 = vmatprep.subr.bf16.mxu0 %v1573_v25 }
  0x75   : > { %1503 = vmatpush3.bf16.msra.mxu0 %v1573_v25 }
  0x76   : > { %1504 = vmatprep.subr.bf16.mxu0 %v1574_v26 }
  0x79   : > { %1505 = vmatpush3.bf16.msra.mxu0 %v1574_v26 }
  0x7a   : > { %1506 = vmatprep.subr.bf16.mxu0 %v1575_v27 }
  0x7d   : > { %1507 = vmatpush3.bf16.msra.mxu0 %v1575_v27 }
  0xff   : > { %v1426_v54 = vpop.f32.mrf.mxu0 }
 0x100   : > { %v1446_v55 = vpop.f32.mrf.mxu1  ;;  %v615_v9 = vadd.f32 %v1426_v54, %v1305_v58 }
 0x101   : > { %v606_v56 = vpop.f32.mrf.mxu0  ;;  %v735_v1 = vadd.f32 %v1446_v55, %v1314_v59 }
 0x102   : > { %v726_v57 = vpop.f32.mrf.mxu1  ;;  %v607_v61 = vadd.f32 %v1305_v58, %v606_v56 }
 0x103   : > { %v1427_v60 = vpop.f32.mrf.mxu0  ;;  %v727_v63 = vadd.f32 %v1314_v59, %v726_v57  ;;  %v867_v18 = vmul.f32 %v735_v1, %v615_v9 }
 0x104   : > { %v1447_v62 = vpop.f32.mrf.mxu1  ;;  %v618_v5 = vadd.f32 %v1427_v60, %v1305_v58  ;;  %v863_v7 = vmul.f32 %v735_v1, %v607_v61 }
 0x105   : > { %v609_v0 = vpop.f32.mrf.mxu0  ;;  %v738_v2 = vadd.f32 %v1447_v62, %v1314_v59  ;;  %v861_v10 = vmul.f32 %v727_v63, %v607_v61  ;;  %v865_v14 = vmul.f32 %v727_v63, %v615_v9 }
 0x106   : > { %v610_v3 = vadd.f32 %v1305_v58, %v609_v0  ;;  %v729_v4 = vpop.f32.mrf.mxu1 }
 0x107   : > { %v730_v6 = vadd.f32 %v1314_v59, %v729_v4  ;;  %v868_v17 = vmul.f32 %v738_v2, %v618_v5 }
 0x108   : > { %v864_v8 = vmul.f32 %v738_v2, %v610_v3  ;;  %v1323_v2 = vld [vmem:[%s1906_s9] ss:$0 sm:$0xff] }
 0x109   : > { %v862_v11 = vmul.f32 %v730_v6, %v610_v3  ;;  %v866_v12 = vmul.f32 %v730_v6, %v618_v5  ;;  %v872_v19 = vpack.c.bf16 %v868_v17, %v867_v18 }
 0x10a   : > { %v870_v13 = vpack.c.bf16 %v864_v8, %v863_v7 }
 0x10b   : > { %v869_v15 = vpack.c.bf16 %v862_v11, %v861_v10  ;;  %v871_v16 = vpack.c.bf16 %v866_v12, %v865_v14 }
 0x10d   : > { %1484 = vmatprep.mubr.bf16.mxu1 %v869_v15 }
 0x10e   : > { %1485 = vmatmul.mubr.bf16.vlgmr.msra.gmra.mxu1 %v870_v13 }
 0x10f   : > { %1488 = vmatprep.mubr.bf16.mxu1 %v871_v16 }
 0x116   : > { %1489 = vmatmul.mubr.bf16.gmra.mxu1 %v872_v19 }
 0x120   : > { %v1466_v56 = vpop.f32.mrf.mxu0 }
 0x121   : > { %v855_v8 = vadd.f32 %v1466_v56, %v1323_v2 }
 0x122   : > { %v846_v59 = vpop.f32.mrf.mxu0 }
 0x123   : > { %v847_v6 = vadd.f32 %v1323_v2, %v846_v59 }
 0x124   : > { %v1467_v63 = vpop.f32.mrf.mxu0 }
 0x125   : > { %v858_v9 = vadd.f32 %v1467_v63, %v1323_v2 }
 0x126   : > { %v849_v4 = vpop.f32.mrf.mxu0 }
 0x127   : > { %v850_v10 = vadd.f32 %v1323_v2, %v849_v4 }
 0x1ce   : > { %v1486_v28 = vpop.f32.mrf.mxu1 }
 0x1d0   : > { %v971_v29 = vpop.f32.mrf.mxu1 }
 0x1d1   : > { %v1002_v30 = vmax.f32 %v971_v29, %v1486_v28 }
 0x1d2   : > { %v1487_v31 = vpop.f32.mrf.mxu1 }
 0x1d3   : > { %v1006_v32 = vsub.f32 %v971_v29, %v1002_v30  ;;  %v1008_v33 = vsub.f32 %v1486_v28, %v1002_v30 }
 0x1d4   : > { %v974_v34 = vpop.f32.mrf.mxu1 }
 0x1d5   : > { %v1014_v35 = vmul.f32 1.442695, %v1006_v32  ;;  %v1018_v36 = vmul.f32 1.442695, %v1008_v33  ;;  %v1003_v37 = vmax.f32 %v974_v34, %v1487_v31 }
 0x1d6   : > { %v1490_v38 = vpop.f32.mrf.mxu1 }
 0x1d7   : > { %1576 = vpow2.f32 %v1014_v35  ;;  %v1007_v39 = vsub.f32 %v974_v34, %v1003_v37  ;;  %v1009_v40 = vsub.f32 %v1487_v31, %v1003_v37  ;;  %v1340_v35 = vld [vmem:[%s1907_s10] ss:$0 sm:$0xff] }
 0x1d8   : > { %1578 = vpow2.f32 %v1018_v36  ;;  %v987_v41 = vpop.f32.mrf.mxu1 }
 0x1d9   : > { %v1016_v42 = vmul.f32 1.442695, %v1007_v39  ;;  %v1020_v43 = vmul.f32 1.442695, %v1009_v40  ;;  %v1004_v44 = vmax.f32 %v987_v41, %v1490_v38 }
 0x1da   : > { %v1491_v45 = vpop.f32.mrf.mxu1 }
 0x1db   : > { %1580 = vpow2.f32 %v1016_v42  ;;  %v1010_v46 = vsub.f32 %v987_v41, %v1004_v44  ;;  %v1012_v47 = vsub.f32 %v1490_v38, %v1004_v44 }
 0x1dc   : > { %1582 = vpow2.f32 %v1020_v43  ;;  %v990_v48 = vpop.f32.mrf.mxu1 }
 0x1dd   : > { %v1022_v49 = vmul.f32 1.442695, %v1010_v46  ;;  %v1026_v50 = vmul.f32 1.442695, %v1012_v47  ;;  %v1005_v51 = vmax.f32 %v990_v48, %v1491_v45 }
 0x1df   : > { %1584 = vpow2.f32 %v1022_v49  ;;  %v1011_v52 = vsub.f32 %v990_v48, %v1005_v51  ;;  %v1013_v53 = vsub.f32 %v1491_v45, %v1005_v51 }
 0x1e0   : > { %1586 = vpow2.f32 %v1026_v50 }
 0x1e1   : > { %v1024_v54 = vmul.f32 1.442695, %v1011_v52  ;;  %v1028_v55 = vmul.f32 1.442695, %v1013_v53 }
 0x1e3   : > { %1588 = vpow2.f32 %v1024_v54 }
 0x1e4   : > { %v1577_v57 = vpop.eup %1576  ;;  %1590 = vpow2.f32 %v1028_v55 }
 0x1e5   : > { %v1579_v58 = vpop.eup %1578  ;;  %v1030_v13 = vmul.f32 %v1577_v57, %v847_v6 }
 0x1e6   : > { %v1042_v60 = vadd.f32 %v1579_v58, %v1577_v57  ;;  %v1032_v14 = vmul.f32 %v1579_v58, %v855_v8 }
 0x1e8   : > { %v1581_v61 = vpop.eup %1580  ;;  %1592 = vrcp.f32 %v1042_v60  ;;  %v1038_v18 = vadd.f32 %v1032_v14, %v1030_v13 }
 0x1e9   : > { %v1583_v62 = vpop.eup %1582  ;;  %v1031_v16 = vmul.f32 %v1581_v61, %v850_v10 }
 0x1ea   : > { %v1043_v0 = vadd.f32 %v1583_v62, %v1581_v61  ;;  %v1033_v15 = vmul.f32 %v1583_v62, %v858_v9 }
 0x1ec   : > { %v1585_v1 = vpop.eup %1584  ;;  %1594 = vrcp.f32 %v1043_v0  ;;  %v1039_v19 = vadd.f32 %v1033_v15, %v1031_v16 }
 0x1ed   : > { %v1587_v3 = vpop.eup %1586  ;;  %v1034_v23 = vmul.f32 %v1585_v1, %v847_v6 }
 0x1ee   : > { %v1044_v5 = vadd.f32 %v1587_v3, %v1585_v1  ;;  %v1036_v24 = vmul.f32 %v1587_v3, %v855_v8 }
 0x1f0   : > { %v1589_v7 = vpop.eup %1588  ;;  %1596 = vrcp.f32 %v1044_v5  ;;  %v1040_v29 = vadd.f32 %v1036_v24, %v1034_v23 }
 0x1f1   : > { %v1591_v11 = vpop.eup %1590  ;;  %v1035_v26 = vmul.f32 %v1589_v7, %v850_v10 }
 0x1f2   : > { %v1045_v12 = vadd.f32 %v1591_v11, %v1589_v7  ;;  %v1037_v25 = vmul.f32 %v1591_v11, %v858_v9 }
 0x1f4   : > { %1598 = vrcp.f32 %v1045_v12  ;;  %v1041_v30 = vadd.f32 %v1037_v25, %v1035_v26 }
 0x1f5   : > { %v1593_v17 = vpop.eup %1592 }
 0x1f6   : > { %v1050_v21 = vmul.f32 %v1593_v17, %v1038_v18 }
 0x1f9   : > { %v1595_v20 = vpop.eup %1594 }
 0x1fa   : > { %v1051_v22 = vmul.f32 %v1595_v20, %v1039_v19 }
 0x1fc   : > { %v1054_v27 = vpack.c.bf16 %v1051_v22, %v1050_v21 }
 0x1fd   : > { %v1597_v28 = vpop.eup %1596 }
 0x1fe   : > { %1508 = vmatprep.mubr.bf16.mxu0 %v1054_v27  ;;  %v1052_v32 = vmul.f32 %v1597_v28, %v1040_v29 }
 0x201   : > { %v1599_v31 = vpop.eup %1598 }
 0x202   : > { %v1053_v33 = vmul.f32 %v1599_v31, %v1041_v30 }
 0x204   : > { %v1055_v34 = vpack.c.bf16 %v1053_v33, %v1052_v32 }
 0x206   : > { %1509 = vmatmul.mubr.bf16.vlgmr.msra.gmra.mxu0 %v1055_v34 }
 0x2c6   : > { %v1510_v36 = vpop.f32.mrf.mxu0 }
 0x2c7   : > { %v1170_v37 = vadd.f32 %v1510_v36, %v1340_v35 }
 0x2c8   : > { %v1161_v38 = vpop.f32.mrf.mxu0 }
 0x2c9   : > { %1178 = vst [vmem:[%s455_s18 + $0x10] sm:$0xff] %v1170_v37  ;;  %v1162_v39 = vadd.f32 %v1340_v35, %v1161_v38 }
 0x2ca   : > { %v1511_v40 = vpop.f32.mrf.mxu0 }
 0x2cb   : > { %1176 = vst [vmem:[%s455_s18] sm:$0xff] %v1162_v39  ;;  %v1173_v41 = vadd.f32 %v1511_v40, %v1340_v35  ;;  %1186 = sbr.rel (!%p1719_p5) target bundleno = 728 (0x2d8), region = 110 }
 0x2cc   : > { %v1164_v42 = vpop.f32.mrf.mxu0 }
 0x2cd   : > { %1179 = vst [vmem:[%s455_s18 + $0x18] sm:$0xff] %v1173_v41  ;;  %v1165_v43 = vadd.f32 %v1340_v35, %v1164_v42 }
 0x2cf   : > { %1177 = vst [vmem:[%s455_s18 + $0x8] sm:$0xff] %v1165_v43 }
 0x2d0   : > { %v1228_v46 = vld [vmem:[%s455_s18 + $0x10] sm:$0xff] }
 0x2d1   : > { %1229 = vst [vmem:[%s1189_s27 + $0x40] sm:$0xff] %v1228_v46 }
 0x2d2   : > { %v1224_v44 = vld [vmem:[%s455_s18] sm:$0xff] }
 0x2d3   : > { %1225 = vst [vmem:[%s1189_s27] sm:$0xff] %v1224_v44 }
 0x2d4   : > { %v1230_v47 = vld [vmem:[%s455_s18 + $0x18] sm:$0xff] }
 0x2d5   : > { %1231 = vst [vmem:[%s1189_s27 + $0x48] sm:$0xff] %v1230_v47 }
 0x2d6   : > { %v1226_v45 = vld [vmem:[%s455_s18 + $0x8] sm:$0xff] }
 0x2d7   : > { %1227 = vst [vmem:[%s1189_s27 + $0x8] sm:$0xff] %v1226_v45 }
 0x2d8 PF: > { %p19_p10 = scmp.ge.s32.totalorder %s1706_s25, 6   ;;  %s1911_s21 = smov %s1618_s22 }
 0x2d9   : > { %s1912_s22 = smov %s1717_s28  ;;  %s1913_s23 = smov %s1706_s25 }
 0x2da   :  { %21 = sbr.rel (!%p19_p10) target bundleno = 2 (0x2), region = 179 }

</bundles_post_ra>
